<compile_context>
chip_gen: v6e
topology: v6e:2x2x1
jax: 0.10.0
libtpu: 0.0.40
codegen_flags: <defaults>
</compile_context>

<pallas_src>
import functools

import jax
import jax.numpy as jnp
from jax import lax
from jax.experimental import pallas as pl
from jax.experimental.pallas import tpu as pltpu


def _leaky(x):
    # LeakyReLU(0.2)
    return jnp.where(x > 0, x, 0.2 * x)


def resd_kernel(patches_ref, mask_ref, w1_ref, w2_ref, ws_ref, bs_ref,
                gamma_ref, out_ref, *, cin, wo, ncols):
    f32 = jnp.float32
    patches = patches_ref[...]                       # (16*Cin, T)

    # ---------------- residual path ----------------
    # conv1: 4x4 / stride 2 / pad 1 (bias-free) as one matmul on im2col patches
    h = jnp.dot(w1_ref[...], patches, preferred_element_type=f32)   # (Cout, T)
    h = _leaky(h)

    # conv2: 3x3 / stride 1 / pad 1 (bias-free).  Each of the 9 taps is a lane
    # roll of h on the flattened (whole-image) spatial axis, zeroed at the
    # image border by a precomputed mask.  Rolls never legitimately cross an
    # image boundary (those positions are exactly the masked ones), so folding
    # batch into lanes is exact.  All 9 channel mixes fuse into one matmul.
    masks = mask_ref[...]                            # (9, T)
    taps = []
    for t in range(9):
        dy, dx = t // 3, t % 3
        off = (dy - 1) * wo + (dx - 1)               # flat source offset
        if off == 0:
            shifted = h
        else:
            # want shifted[:, i] = h[:, i + off]  (jnp.roll semantics)
            shifted = pltpu.roll(h, (-off) % ncols, 1)
        taps.append(shifted * masks[t:t + 1, :])
    stacked = jnp.concatenate(taps, axis=0)          # (9*Cout, T)
    res = _leaky(jnp.dot(w2_ref[...], stacked, preferred_element_type=f32))

    # ---------------- shortcut path ----------------
    # avg_pool2d(x, 2) from the 4 interior conv1 taps (never in the padding):
    # taps (ki,kj) in {(1,1),(1,2),(2,1),(2,2)} -> tap indices 5, 6, 9, 10.
    pooled = 0.25 * (patches[5 * cin:6 * cin] + patches[6 * cin:7 * cin] +
                     patches[9 * cin:10 * cin] + patches[10 * cin:11 * cin])
    sc = jnp.dot(ws_ref[...], pooled, preferred_element_type=f32) + bs_ref[...]

    # ---------------- combine:  shortcut + gamma * residual ----------------
    out_ref[...] = sc + gamma_ref[0] * res


def resd_forward(x, w1, w2, ws, bs, gamma):
    """x: (B, Cin, H, W) f32.  Weights in PyTorch layouts:
       w1 (Cout,Cin,4,4), w2 (Cout,Cout,3,3), ws (Cout,Cin,1,1), bs (Cout,),
       gamma (1,).  Returns (B, Cout, H//2, W//2)."""
    f32 = jnp.float32
    B, Cin, H, W = x.shape
    Cout = w1.shape[0]
    Ho, Wo = H // 2, W // 2
    S = Ho * Wo
    K1 = 4

    x = x.astype(f32)

    # ---- wrapper-side layout plumbing (pure JAX) ----
    # conv1 im2col, tap-major / channel-minor rows; batch folded into lanes:
    # columns ordered (b, oy, ox) so the output reshapes straight back to NCHW.
    xp = jnp.pad(x, ((0, 0), (0, 0), (1, 1), (1, 1)))
    taps = []
    for ki in range(K1):
        for kj in range(K1):
            t = xp[:, :, ki:ki + 2 * Ho:2, kj:kj + 2 * Wo:2]   # (B,Cin,Ho,Wo)
            taps.append(jnp.transpose(t, (1, 0, 2, 3)))        # (Cin,B,Ho,Wo)
    patches = jnp.stack(taps, axis=0).reshape(K1 * K1 * Cin, B * S)

    w1_mat = jnp.transpose(w1.astype(f32), (0, 2, 3, 1)).reshape(Cout, K1 * K1 * Cin)
    w2_mat = jnp.transpose(w2.astype(f32), (0, 2, 3, 1)).reshape(Cout, 9 * Cout)
    ws_mat = ws.astype(f32).reshape(Cout, Cin)
    bs_col = bs.astype(f32).reshape(Cout, 1)
    gamma_s = jnp.asarray(gamma, f32).reshape(1,)

    # 3x3 border masks (1 inside, 0 where the shifted source falls in the pad),
    # tiled per image to cover the (b, oy, ox) lane layout.
    oy, ox = jnp.meshgrid(jnp.arange(Ho), jnp.arange(Wo), indexing="ij")
    mrows = []
    for dy in range(3):
        for dx in range(3):
            iy, ix = oy + dy - 1, ox + dx - 1
            valid = ((iy >= 0) & (iy < Ho) & (ix >= 0) & (ix < Wo)).ravel()
            mrows.append(valid.astype(f32))
    mask = jnp.tile(jnp.stack(mrows, axis=0), (1, B))            # (9, B*S)

    # ---- grid: whole-image lane chunks (>=128 lanes / step when chunked) ----
    imgs_per_step = max(1, min(B, max(1, 2048 // S)))
    while B % imgs_per_step:
        imgs_per_step -= 1
    T = imgs_per_step * S
    if imgs_per_step != B and (T % 128) != 0:
        imgs_per_step, T = B, B * S          # keep lane blocks 128-aligned
    grid = (B // imgs_per_step,)

    kernel = functools.partial(resd_kernel, cin=Cin, wo=Wo, ncols=T)

    out = pl.pallas_call(
        kernel,
        out_shape=jax.ShapeDtypeStruct((Cout, B * S), f32),
        grid=grid,
        in_specs=[
            pl.BlockSpec((K1 * K1 * Cin, T), lambda j: (0, j)),    # patches
            pl.BlockSpec((9, T), lambda j: (0, j)),                # border masks
            pl.BlockSpec((Cout, K1 * K1 * Cin), lambda j: (0, 0)), # W1 (resident)
            pl.BlockSpec((Cout, 9 * Cout), lambda j: (0, 0)),      # W2 (resident)
            pl.BlockSpec((Cout, Cin), lambda j: (0, 0)),           # Ws
            pl.BlockSpec((Cout, 1), lambda j: (0, 0)),             # bs
            pl.BlockSpec(memory_space=pltpu.MemorySpace.SMEM),     # gamma scalar
        ],
        out_specs=pl.BlockSpec((Cout, T), lambda j: (0, j)),
        compiler_params=pltpu.CompilerParams(
            dimension_semantics=("parallel",)),
    )(patches, mask, w1_mat, w2_mat, ws_mat, bs_col, gamma_s)

    return jnp.transpose(out.reshape(Cout, B, Ho, Wo), (1, 0, 2, 3))


def resd_reference(x, w1, w2, ws, bs, gamma):
    dn = ("NCHW", "OIHW", "NCHW")
    hp = lax.Precision.HIGHEST
    h = lax.conv_general_dilated(x, w1, (2, 2), ((1, 1), (1, 1)),
                                 dimension_numbers=dn, precision=hp)
    h = _leaky(h)
    h = lax.conv_general_dilated(h, w2, (1, 1), ((1, 1), (1, 1)),
                                 dimension_numbers=dn, precision=hp)
    h = _leaky(h)
    s = lax.conv_general_dilated(x, ws, (1, 1), ((0, 0), (0, 0)),
                                 dimension_numbers=dn, precision=hp)
    s = s + bs.reshape(1, -1, 1, 1)
    s = lax.reduce_window(s, 0.0, lax.add, (1, 1, 2, 2), (1, 1, 2, 2),
                          "VALID") / 4.0
    return s + gamma.reshape(()) * h


if __name__ == "__main__":
    key = jax.random.PRNGKey(0)
    k_x, k_w1, k_w2, k_ws, k_bs = jax.random.split(key, 5)

    B, FIN, FOUT, H, W = 2, 4, 8, 16, 16   # fin != fout -> learned shortcut

    x = jax.random.normal(k_x, (B, FIN, H, W), dtype=jnp.float32)
    w1 = jax.random.normal(k_w1, (FOUT, FIN, 4, 4), dtype=jnp.float32) * 0.05
    w2 = jax.random.normal(k_w2, (FOUT, FOUT, 3, 3), dtype=jnp.float32) * 0.05
    ws = jax.random.normal(k_ws, (FOUT, FIN, 1, 1), dtype=jnp.float32) * 0.05
    bs = jax.random.normal(k_bs, (FOUT,), dtype=jnp.float32) * 0.05
    # PyTorch initialises gamma = zeros(1); use a nonzero value so the residual
    # branch is actually exercised by the numeric check (formula unchanged).
    gamma = jnp.array([0.7], dtype=jnp.float32)

    out = resd_forward(x, w1, w2, ws, bs, gamma)
    jax.block_until_ready(out)

    ref = resd_reference(x, w1, w2, ws, bs, gamma)
    assert out.shape == (B, FOUT, H // 2, W // 2), out.shape
    assert jnp.allclose(out, ref, atol=5e-4, rtol=5e-4), \
        float(jnp.max(jnp.abs(out - ref)))

    print("KERNEL_OK")
</pallas_src>

<mosaic_0001>
module attributes {stable_mosaic.version = 11 : i64} {
  func.func @resd_kernel(%arg0: i32, %arg1: memref<64x128xf32, #tpu.memory_space<vmem>>, %arg2: memref<9x128xf32, #tpu.memory_space<vmem>>, %arg3: memref<8x64xf32, #tpu.memory_space<vmem>>, %arg4: memref<8x72xf32, #tpu.memory_space<vmem>>, %arg5: memref<8x4xf32, #tpu.memory_space<vmem>>, %arg6: memref<8x1xf32, #tpu.memory_space<vmem>>, %arg7: memref<1xf32, #tpu.memory_space<smem>>, %arg8: memref<8x128xf32, #tpu.memory_space<vmem>>) attributes {dimension_semantics = [#tpu.dimension_semantics<parallel>], iteration_bounds = array<i64: 1>, scalar_prefetch = 0 : i64, scratch_operands = 0 : i64, tpu.core_type = #tpu.core_type<tc>, window_params = [{transform_indices = @transform_0, window_bounds = array<i64: 64, 128>}, {transform_indices = @transform_1, window_bounds = array<i64: 9, 128>}, {pipeline_mode = #tpu.pipeline_mode<synchronous>, transform_indices = @transform_2, window_bounds = array<i64: 8, 64>}, {pipeline_mode = #tpu.pipeline_mode<synchronous>, transform_indices = @transform_3, window_bounds = array<i64: 8, 72>}, {pipeline_mode = #tpu.pipeline_mode<synchronous>, transform_indices = @transform_4, window_bounds = array<i64: 8, 4>}, {pipeline_mode = #tpu.pipeline_mode<synchronous>, transform_indices = @transform_5, window_bounds = array<i64: 8, 1>}, {transform_indices = @transform_6, window_bounds = array<i64: 1>}, {transform_indices = @transform_7, window_bounds = array<i64: 8, 128>}]} {
    %c0 = arith.constant 0 : index
    %c0_0 = arith.constant 0 : index
    %0 = vector.load %arg1[%c0, %c0_0] : memref<64x128xf32, #tpu.memory_space<vmem>>, vector<64x128xf32>
    %c0_1 = arith.constant 0 : index
    %c0_2 = arith.constant 0 : index
    %1 = vector.load %arg3[%c0_1, %c0_2] : memref<8x64xf32, #tpu.memory_space<vmem>>, vector<8x64xf32>
    %cst = arith.constant dense<0.000000e+00> : vector<8x128xf32>
    %2 = tpu.matmul %1, %0, %cst {dimension_numbers = #tpu.dot_dimension_numbers<[1], [0], [0], [1], [0, 0, 1, 1], [], []>} : vector<8x64xf32>, vector<64x128xf32>, vector<8x128xf32> -> vector<8x128xf32>
    %cst_3 = arith.constant 0.000000e+00 : f32
    %3 = vector.broadcast %cst_3 : f32 to vector<8x128xf32>
    %4 = arith.cmpf ogt, %2, %3 : vector<8x128xf32>
    %cst_4 = arith.constant 2.000000e-01 : f32
    %5 = vector.broadcast %cst_4 : f32 to vector<8x128xf32>
    %6 = arith.mulf %5, %2 : vector<8x128xf32>
    %7 = arith.select %4, %2, %6 : vector<8x128xi1>, vector<8x128xf32>
    %c0_5 = arith.constant 0 : index
    %c0_6 = arith.constant 0 : index
    %8 = vector.load %arg2[%c0_5, %c0_6] : memref<9x128xf32, #tpu.memory_space<vmem>>, vector<9x128xf32>
    %c9_i32 = arith.constant 9 : i32
    %9 = tpu.dynamic_rotate %7 by %c9_i32 dim 1 : vector<8x128xf32>, i32 -> vector<8x128xf32>
    %10 = vector.extract_strided_slice %8 {offsets = [0, 0], sizes = [1, 128], strides = [1, 1]} : vector<9x128xf32> to vector<1x128xf32>
    %11 = vector.broadcast %10 : vector<1x128xf32> to vector<8x128xf32>
    %12 = arith.mulf %9, %11 : vector<8x128xf32>
    %c8_i32 = arith.constant 8 : i32
    %13 = tpu.dynamic_rotate %7 by %c8_i32 dim 1 : vector<8x128xf32>, i32 -> vector<8x128xf32>
    %14 = vector.extract_strided_slice %8 {offsets = [1, 0], sizes = [1, 128], strides = [1, 1]} : vector<9x128xf32> to vector<1x128xf32>
    %15 = vector.broadcast %14 : vector<1x128xf32> to vector<8x128xf32>
    %16 = arith.mulf %13, %15 : vector<8x128xf32>
    %c7_i32 = arith.constant 7 : i32
    %17 = tpu.dynamic_rotate %7 by %c7_i32 dim 1 : vector<8x128xf32>, i32 -> vector<8x128xf32>
    %18 = vector.extract_strided_slice %8 {offsets = [2, 0], sizes = [1, 128], strides = [1, 1]} : vector<9x128xf32> to vector<1x128xf32>
    %19 = vector.broadcast %18 : vector<1x128xf32> to vector<8x128xf32>
    %20 = arith.mulf %17, %19 : vector<8x128xf32>
    %c1_i32 = arith.constant 1 : i32
    %21 = tpu.dynamic_rotate %7 by %c1_i32 dim 1 : vector<8x128xf32>, i32 -> vector<8x128xf32>
    %22 = vector.extract_strided_slice %8 {offsets = [3, 0], sizes = [1, 128], strides = [1, 1]} : vector<9x128xf32> to vector<1x128xf32>
    %23 = vector.broadcast %22 : vector<1x128xf32> to vector<8x128xf32>
    %24 = arith.mulf %21, %23 : vector<8x128xf32>
    %25 = vector.extract_strided_slice %8 {offsets = [4, 0], sizes = [1, 128], strides = [1, 1]} : vector<9x128xf32> to vector<1x128xf32>
    %26 = vector.broadcast %25 : vector<1x128xf32> to vector<8x128xf32>
    %27 = arith.mulf %7, %26 : vector<8x128xf32>
    %c127_i32 = arith.constant 127 : i32
    %28 = tpu.dynamic_rotate %7 by %c127_i32 dim 1 : vector<8x128xf32>, i32 -> vector<8x128xf32>
    %29 = vector.extract_strided_slice %8 {offsets = [5, 0], sizes = [1, 128], strides = [1, 1]} : vector<9x128xf32> to vector<1x128xf32>
    %30 = vector.broadcast %29 : vector<1x128xf32> to vector<8x128xf32>
    %31 = arith.mulf %28, %30 : vector<8x128xf32>
    %c121_i32 = arith.constant 121 : i32
    %32 = tpu.dynamic_rotate %7 by %c121_i32 dim 1 : vector<8x128xf32>, i32 -> vector<8x128xf32>
    %33 = vector.extract_strided_slice %8 {offsets = [6, 0], sizes = [1, 128], strides = [1, 1]} : vector<9x128xf32> to vector<1x128xf32>
    %34 = vector.broadcast %33 : vector<1x128xf32> to vector<8x128xf32>
    %35 = arith.mulf %32, %34 : vector<8x128xf32>
    %c120_i32 = arith.constant 120 : i32
    %36 = tpu.dynamic_rotate %7 by %c120_i32 dim 1 : vector<8x128xf32>, i32 -> vector<8x128xf32>
    %37 = vector.extract_strided_slice %8 {offsets = [7, 0], sizes = [1, 128], strides = [1, 1]} : vector<9x128xf32> to vector<1x128xf32>
    %38 = vector.broadcast %37 : vector<1x128xf32> to vector<8x128xf32>
    %39 = arith.mulf %36, %38 : vector<8x128xf32>
    %c119_i32 = arith.constant 119 : i32
    %40 = tpu.dynamic_rotate %7 by %c119_i32 dim 1 : vector<8x128xf32>, i32 -> vector<8x128xf32>
    %41 = vector.extract_strided_slice %8 {offsets = [8, 0], sizes = [1, 128], strides = [1, 1]} : vector<9x128xf32> to vector<1x128xf32>
    %42 = vector.broadcast %41 : vector<1x128xf32> to vector<8x128xf32>
    %43 = arith.mulf %40, %42 : vector<8x128xf32>
    %44 = tpu.concatenate %12, %16, %20, %24, %27, %31, %35, %39, %43 in 0 : vector<8x128xf32>, vector<8x128xf32>, vector<8x128xf32>, vector<8x128xf32>, vector<8x128xf32>, vector<8x128xf32>, vector<8x128xf32>, vector<8x128xf32>, vector<8x128xf32> -> vector<72x128xf32>
    %c0_7 = arith.constant 0 : index
    %c0_8 = arith.constant 0 : index
    %45 = vector.load %arg4[%c0_7, %c0_8] : memref<8x72xf32, #tpu.memory_space<vmem>>, vector<8x72xf32>
    %cst_9 = arith.constant dense<0.000000e+00> : vector<8x128xf32>
    %46 = tpu.matmul %45, %44, %cst_9 {dimension_numbers = #tpu.dot_dimension_numbers<[1], [0], [0], [1], [0, 0, 1, 1], [], []>} : vector<8x72xf32>, vector<72x128xf32>, vector<8x128xf32> -> vector<8x128xf32>
    %cst_10 = arith.constant 0.000000e+00 : f32
    %47 = vector.broadcast %cst_10 : f32 to vector<8x128xf32>
    %48 = arith.cmpf ogt, %46, %47 : vector<8x128xf32>
    %cst_11 = arith.constant 2.000000e-01 : f32
    %49 = vector.broadcast %cst_11 : f32 to vector<8x128xf32>
    %50 = arith.mulf %49, %46 : vector<8x128xf32>
    %51 = arith.select %48, %46, %50 : vector<8x128xi1>, vector<8x128xf32>
    %52 = vector.extract_strided_slice %0 {offsets = [20, 0], sizes = [4, 128], strides = [1, 1]} : vector<64x128xf32> to vector<4x128xf32>
    %53 = vector.extract_strided_slice %0 {offsets = [24, 0], sizes = [4, 128], strides = [1, 1]} : vector<64x128xf32> to vector<4x128xf32>
    %54 = arith.addf %52, %53 : vector<4x128xf32>
    %55 = vector.extract_strided_slice %0 {offsets = [36, 0], sizes = [4, 128], strides = [1, 1]} : vector<64x128xf32> to vector<4x128xf32>
    %56 = arith.addf %54, %55 : vector<4x128xf32>
    %57 = vector.extract_strided_slice %0 {offsets = [40, 0], sizes = [4, 128], strides = [1, 1]} : vector<64x128xf32> to vector<4x128xf32>
    %58 = arith.addf %56, %57 : vector<4x128xf32>
    %cst_12 = arith.constant 2.500000e-01 : f32
    %59 = vector.broadcast %cst_12 : f32 to vector<4x128xf32>
    %60 = arith.mulf %59, %58 : vector<4x128xf32>
    %c0_13 = arith.constant 0 : index
    %c0_14 = arith.constant 0 : index
    %61 = vector.load %arg5[%c0_13, %c0_14] : memref<8x4xf32, #tpu.memory_space<vmem>>, vector<8x4xf32>
    %cst_15 = arith.constant dense<0.000000e+00> : vector<8x128xf32>
    %62 = tpu.matmul %61, %60, %cst_15 {dimension_numbers = #tpu.dot_dimension_numbers<[1], [0], [0], [1], [0, 0, 1, 1], [], []>} : vector<8x4xf32>, vector<4x128xf32>, vector<8x128xf32> -> vector<8x128xf32>
    %c0_16 = arith.constant 0 : index
    %c0_17 = arith.constant 0 : index
    %63 = vector.load %arg6[%c0_16, %c0_17] : memref<8x1xf32, #tpu.memory_space<vmem>>, vector<8x1xf32>
    %64 = vector.broadcast %63 : vector<8x1xf32> to vector<8x128xf32>
    %65 = arith.addf %62, %64 : vector<8x128xf32>
    %c0_18 = arith.constant 0 : index
    %66 = memref.load %arg7[%c0_18] : memref<1xf32, #tpu.memory_space<smem>>
    %67 = vector.broadcast %66 : f32 to vector<8x128xf32>
    %68 = arith.mulf %67, %51 : vector<8x128xf32>
    %69 = arith.addf %65, %68 : vector<8x128xf32>
    %c0_19 = arith.constant 0 : index
    %c0_20 = arith.constant 0 : index
    %70 = vector.load %arg8[%c0_19, %c0_20] : memref<8x128xf32, #tpu.memory_space<vmem>>, vector<8x128xf32>
    tpu.vector_store %arg8[%c0_19, %c0_20], %69 {strides = array<i32>} : memref<8x128xf32, #tpu.memory_space<vmem>>, vector<8x128xf32>,
    return
  }
  func.func @transform_0(%arg0: i32) -> (i32, i32) {
    %c0_i32 = arith.constant 0 : i32
    %c0_i32_0 = arith.constant 0 : i32
    return %c0_i32, %arg0 : i32, i32
  }
  func.func @transform_1(%arg0: i32) -> (i32, i32) {
    %c0_i32 = arith.constant 0 : i32
    %c0_i32_0 = arith.constant 0 : i32
    return %c0_i32, %arg0 : i32, i32
  }
  func.func @transform_2(%arg0: i32) -> (i32, i32) {
    %c0_i32 = arith.constant 0 : i32
    %c0_i32_0 = arith.constant 0 : i32
    %c0_i32_1 = arith.constant 0 : i32
    return %c0_i32, %c0_i32_0 : i32, i32
  }
  func.func @transform_3(%arg0: i32) -> (i32, i32) {
    %c0_i32 = arith.constant 0 : i32
    %c0_i32_0 = arith.constant 0 : i32
    %c0_i32_1 = arith.constant 0 : i32
    return %c0_i32, %c0_i32_0 : i32, i32
  }
  func.func @transform_4(%arg0: i32) -> (i32, i32) {
    %c0_i32 = arith.constant 0 : i32
    %c0_i32_0 = arith.constant 0 : i32
    %c0_i32_1 = arith.constant 0 : i32
    return %c0_i32, %c0_i32_0 : i32, i32
  }
  func.func @transform_5(%arg0: i32) -> (i32, i32) {
    %c0_i32 = arith.constant 0 : i32
    %c0_i32_0 = arith.constant 0 : i32
    %c0_i32_1 = arith.constant 0 : i32
    return %c0_i32, %c0_i32_0 : i32, i32
  }
  func.func @transform_6(%arg0: i32) -> i32 {
    %c0_i32 = arith.constant 0 : i32
    %c0_i32_0 = arith.constant 0 : i32
    return %c0_i32 : i32
  }
  func.func @transform_7(%arg0: i32) -> (i32, i32) {
    %c0_i32 = arith.constant 0 : i32
    %c0_i32_0 = arith.constant 0 : i32
    return %c0_i32, %arg0 : i32, i32
  }
}

</mosaic_0001>

<bundles_post_ra>
// kernel: tpu_custom_call.1
= control target key start
LH: loop header
LB: loop body
LE: loop exit
PB: predicated region body
PF: predicated region fallthrough
CT: control target
= control target key end

     0   :  { %13 = vsyncpa [#allocation4], 0  ;;  %s659_s0 = inlined_call_operand.hbm [shape: f32[64,128], index: 0, kind: input, shape index: {}]   ;;  %s660_s1 = inlined_call_operand.vmem [shape: f32[9,128], index: 1, kind: input, shape index: {}]   ;;  %s661_s2 = inlined_call_operand.vmem [shape: f32[8,64], index: 2, kind: input, shape index: {}]   ;;  %s662_s3 = inlined_call_operand.hbm [shape: f32[8,72], index: 3, kind: input, shape index: {}]   ;;  %s663_s4 = inlined_call_operand.vmem [shape: f32[8,4], index: 4, kind: input, shape index: {}]   ;;  %s664_s5 = inlined_call_operand.vmem [shape: f32[8,1], index: 5, kind: input, shape index: {}]   ;;  %s665_s6 = inlined_call_operand.<no memory space> [shape: f32[1], index: 6, kind: input, shape index: {}]   ;;  %s666_s7 = inlined_call_operand.hbm [shape: f32[8,128], index: 7, kind: output, shape index: {}]  }
   0x1   :  { %14 = vsyncpa [#allocation7], 0 }
   0x2   :  { %15 = vsyncpa [#allocation5], 0  ;;  %s551_s24 = smov [#allocation3]  }
   0x3   :  { %s21_s25 = sshll.u32 %s551_s24, 4  ;;  %s22_s25 = int_to_ptr.vmem [resolvable:$true] %s21_s25 }
   0x4   :  { %s493_s26 = scalar_lea.vmem %s22_s25, 1024  ;;  %p498_p1 = scmp.lt.s32.totalorder %s22_s25, %s22_s25 }
   0x5   :  { %p494_p0 = scmp.ne.s32.totalorder %s22_s25, %s493_s26  ;;  %p499_p2 = scmp.lt.s32.totalorder %s493_s26, %s493_s26 }
   0x7   :  { %p500_p3 = por %p499_p2, %p498_p1 }
   0x9   :  { %p501_p4 = pnand %p500_p3, %p494_p0 }
   0xb   :  { %504 = shalt.err (!%p501_p4)
}
   0xc   :  { %s552_s27 = smov 128   ;;  %s553_s28 = smov 8  }
   0xd   :  { %27 = dma.hbm_to_vmem [thread:$0]  %s659_s0, 1024, %s22_s25, [#allocation4], %s552_s27, %s552_s27, %s553_s28  }
   0xe   :  { %s554_s8 = smov [#allocation6]  }
   0xf   :  { %s38_s9 = sshll.u32 %s554_s8, 4  ;;  %s39_s9 = int_to_ptr.vmem [resolvable:$true] %s38_s9 }
  0x10   :  { %s513_s10 = scalar_lea.vmem %s39_s9, 128  ;;  %p518_p6 = scmp.lt.s32.totalorder %s39_s9, %s39_s9 }
  0x11   :  { %p514_p5 = scmp.ne.s32.totalorder %s39_s9, %s513_s10  ;;  %p519_p7 = scmp.lt.s32.totalorder %s513_s10, %s513_s10 }
  0x13   :  { %p520_p8 = por %p519_p7, %p518_p6 }
  0x15   :  { %p521_p9 = pnand %p520_p8, %p514_p5 }
  0x17   :  { %524 = shalt.err (!%p521_p9)
}
  0x18   :  { %41 = dma.hbm_to_vmem [thread:$0]  %s662_s3, 128, %s39_s9, [#allocation7]  }
  0x19   :  { %545 = dma.done.wait [#allocation4], 1024  }
  0x1a   :  { %546 = vsyncadd [#allocation4], 4294966272 }
  0x1b   :  { %547 = dma.done.wait [#allocation7], 128  }
  0x1c   :  { %548 = vsyncadd [#allocation7], 4294967168  ;;  %v555_v0 = vmov 0.0   ;;  %vm556_vm0 = vmmov 0   ;;  %v61_v1 = vld [vmem:[#allocation3 + $0x38] sm:$0xff]  ;;  %v60_v2 = vld [vmem:[#allocation3 + $0x30] sm:$0xff]  ;;  %v144_v24 = vlaneseq }
  0x1d   :  { %424 = vmatprep.subr.mxu0 %v555_v0  ;;  %440 = vmatprep.mubr.msk.f32.mxu0 %vm556_vm0, %v555_v0  ;;  %v57_v3 = vld [vmem:[#allocation3 + $0x18] sm:$0xff]  ;;  %v59_v4 = vld [vmem:[#allocation3 + $0x28] sm:$0xff]  ;;  %v56_v6 = vld [vmem:[#allocation3 + $0x10] sm:$0xff]  ;;  %vm63_vm1 = vcmask 523264   ;;  %s557_s13 = smov 121   ;;  %s558_s14 = smov 119  }
  0x1e   :  { %443 = vmatprep.subr.mxu1 %v555_v0  ;;  %461 = vmatprep.mubr.msk.f32.mxu1 %vm556_vm0, %v555_v0  ;;  %v282_v5 = vrot.slane %v57_v3, 4  ;;  %v287_v7 = vrot.slane %v59_v4, 4  ;;  %v58_v8 = vld [vmem:[#allocation3 + $0x20] sm:$0xff]  ;;  %v55_v12 = vld [vmem:[#allocation3 + $0x8] sm:$0xff]  ;;  %s560_s15 = smov 120   ;;  %vm304_vm3 = vcmask 1043456  }
  0x1f   :  { %425 = vmatpush3.msra.mxu0 %v61_v1  ;;  %v54_v13 = vld [vmem:[#allocation3] sm:$0xff]  ;;  %s561_s16 = smov 7   ;;  %s562_s17 = smov 1   ;;  %vm300_vm4 = vcmask 31744   ;;  %v563_v22 = vmov 0   ;;  %v145_v25 = vshrl.u32 %v144_v24, 7 }
  0x20   :  { %426 = vmatprep.subr.mxu0 %v555_v0  ;;  %v284_v9 = vadd.f32 %v282_v5, %v56_v6  ;;  %v62_v14 = vld [vmem:[%s661_s2] sm:$0xff]  ;;  %s559_s2 = smov 127   ;;  %484 = vset.pattern.permute.xlu0 %v563_v22  ;;  %s564_s20 = smov 9   ;;  %v399_v27 = vld [vmem:[%s660_s1 + $0x8] ss:$0 sm:$0xff]  ;;  %vm204_vm5 = vcmask 588800  }
  0x21   :  { %427 = vmatpush3.msra.mxu0 %v60_v2  ;;  %v291_v21 = vld [vmem:[%s663_s4] sm:$0xff]  ;;  %v193_v26 = vsub.s32 7, %v145_v25  ;;  %v186_v28 = vsub.s32 6, %v145_v25  ;;  %v179_v33 = vsub.s32 5, %v145_v25  ;;  %v172_v36 = vsub.s32 4, %v145_v25  ;;  %s565_s26 = smov [#allocation8]  }
  0x22   :  { %428 = vmatprep.subr.mxu0 %v555_v0  ;;  %v285_v10 = vadd.f32 %v284_v9, %v58_v8  ;;  %v292_v23 = vld [vmem:[%s664_s5] sm:$0xff]  ;;  %v167_v41 = vsub.s32 3, %v145_v25  ;;  %v160_v43 = vsub.s32 2, %v145_v25  ;;  %v153_v48 = vsub.s32 1, %v145_v25  ;;  %s388_s27 = sshll.u32 %s565_s26, 4  ;;  %s389_s27 = int_to_ptr.vmem [resolvable:$true] %s388_s27 }
  0x23   :  { %429 = vmatpush3.msra.mxu0 %v59_v4  ;;  %v140_v29 = vld [vmem:[%s660_s1] sm:$0xff]  ;;  %v146_v51 = vsub.s32 0, %v145_v25  ;;  %v378_v4 = vstv %s665_s6  ;;  %p530_p11 = scmp.lt.s32.totalorder %s389_s27, %s389_s27 }
  0x24   :  { %430 = vmatprep.subr.mxu0 %v555_v0  ;;  %v289_v11 = vadd.f32 %v287_v7, %v285_v10  ;;  %v194_v34 = vrot.slane %v140_v29, %v193_v26  ;;  %v187_v35 = vrot.slane %v140_v29, %v186_v28  ;;  %v180_v39 = vrot.slane %v140_v29, %v179_v33  ;;  %v203_v61 = vld [vmem:[#allocation6] sm:$0xff] }
  0x25   :  { %431 = vmatpush3.msra.mxu0 %v58_v8  ;;  %v173_v44 = vrot.slane %v140_v29, %v172_v36  ;;  %v168_v47 = vrot.slane %v140_v29, %v167_v41  ;;  %v161_v50 = vrot.slane %v140_v29, %v160_v43  ;;  %v154_v54 = vrot.slane %v140_v29, %v153_v48 }
  0x26   :  { %432 = vmatprep.subr.mxu0 %v555_v0  ;;  %v290_v19 = vmul.f32 0.25, %v289_v11  ;;  %v147_v57 = vrot.slane %v140_v29, %v146_v51 }
  0x27   :  { %433 = vmatpush3.msra.mxu0 %v57_v3 }
  0x28   :  { %434 = vmatprep.subr.mxu0 %v555_v0  ;;  %v299_v20 = vrot.slane %v290_v19, 4 }
  0x29   :  { %435 = vmatpush3.msra.mxu0 %v56_v6 }
  0x2a   :  { %436 = vmatprep.subr.mxu0 %v555_v0 }
  0x2b   :  { %437 = vmatpush3.msra.mxu0 %v55_v12 }
  0x2c   :  { %438 = vmatprep.subr.mxu0 %v555_v0 }
  0x2d   :  { %439 = vmatpush3.msra.mxu0 %v54_v13 }
  0x2e   :  { %441 = vmatmul.mubr.msk.f32.vlgmr.msra.gmra.mxu0 %vm63_vm1, %v62_v14  ;;  %464 = vmatprep.subr.mxu0 %v555_v0 }
  0x2f   :  { %466 = vmatprep.mubr.msk.f32.mxu0 %vm556_vm0, %v555_v0  ;;  %465 = vmatpush3.msk.msra.mxu0 %vm304_vm3, %v299_v20 }
  0x32   :  { %467 = vmatmul.mubr.msk.f32.vlgmr.msra.gmra.mxu0 %vm300_vm4, %v291_v21 }
  0xee   :  { %v133_v15 = vpop.f32.mrf.mxu0 }
  0xef   :  { %vm137_vm2 = vcmp.gt.f32.partialorder %v133_v15, 0.0  ;;  %v138_v16 = vmul.f32 0.2, %v133_v15 }
  0xf0   :  { %v442_v17 = vpop.f32.mrf.mxu0 }
  0xf1   :  { %v139_v18 = vsel %vm137_vm2, %v133_v15, %v138_v16 }
  0xf2   :  { %182 = vrot.lane.b32.xlu1 %v139_v18, %s557_s13  ;;  %196 = vrot.lane.b32.xlu0 %v139_v18, %s558_s14  ;;  %v174_v52 = vmul.f32 %v173_v44, %v139_v18  ;;  %v373_v62 = vpop.f32.mrf.mxu0 }
  0xf4   :  { %v468_v63 = vpop.f32.mrf.mxu0 }
  0xf6   :  { %175 = vrot.lane.b32.xlu1 %v139_v18, %s559_s2  ;;  %189 = vrot.lane.b32.xlu0 %v139_v18, %s560_s15 }
  0xfa   :  { %156 = vrot.lane.b32.xlu1 %v139_v18, %s561_s16  ;;  %163 = vrot.lane.b32.xlu0 %v139_v18, %s562_s17 }
  0xfe   :  { %142 = vrot.lane.b32.xlu1 %v139_v18, %s564_s20  ;;  %149 = vrot.lane.b32.xlu0 %v139_v18, %s553_s28  ;;  %s525_s28 = scalar_lea.vmem %s389_s27, 128 }
  0xff   :  { %p526_p10 = scmp.ne.s32.totalorder %s389_s27, %s525_s28  ;;  %p531_p12 = scmp.lt.s32.totalorder %s525_s28, %s525_s28 }
 0x101   :  { %p532_p13 = por %p531_p12, %p530_p11 }
 0x102   :  { %295 = vperm.xlu0 %484, %v292_v23  }
 0x103   :  { %p533_p0 = pnand %p532_p13, %p526_p10 }
 0x164   :  { %v183_v30 = vpop.permute.xlu1 %182  ;;  %v197_v31 = vpop.permute.xlu0 %196 }
 0x165   :  { %v202_v32 = vmul.f32 %v399_v27, %v197_v31  ;;  %v188_v42 = vmul.f32 %v187_v35, %v183_v30 }
 0x167   :  { %444 = vmatpush3.msra.mxu1 %v202_v32 }
 0x168   :  { %v176_v37 = vpop.permute.xlu1 %175  ;;  %v190_v38 = vpop.permute.xlu0 %189  ;;  %445 = vmatprep.subr.mxu1 %v555_v0 }
 0x169   :  { %v195_v40 = vmul.f32 %v194_v34, %v190_v38  ;;  %v181_v46 = vmul.f32 %v180_v39, %v176_v37 }
 0x16b   :  { %446 = vmatpush3.msra.mxu1 %v195_v40 }
 0x16c   :  { %447 = vmatprep.subr.mxu1 %v555_v0  ;;  %v164_v45 = vpop.permute.xlu0 %163  ;;  %v157_v49 = vpop.permute.xlu1 %156 }
 0x16d   :  { %448 = vmatpush3.msra.mxu1 %v188_v42  ;;  %v169_v53 = vmul.f32 %v168_v47, %v164_v45  ;;  %v162_v56 = vmul.f32 %v161_v50, %v157_v49 }
 0x16e   :  { %449 = vmatprep.subr.mxu1 %v555_v0 }
 0x16f   :  { %450 = vmatpush3.msra.mxu1 %v181_v46 }
 0x170   :  { %451 = vmatprep.subr.mxu1 %v555_v0  ;;  %v150_v55 = vpop.permute.xlu0 %149  ;;  %v143_v58 = vpop.permute.xlu1 %142 }
 0x171   :  { %452 = vmatpush3.msra.mxu1 %v174_v52  ;;  %v155_v59 = vmul.f32 %v154_v54, %v150_v55  ;;  %v148_v60 = vmul.f32 %v147_v57, %v143_v58 }
 0x172   :  { %453 = vmatprep.subr.mxu1 %v555_v0 }
 0x173   :  { %454 = vmatpush3.msra.mxu1 %v169_v53 }
 0x174   :  { %455 = vmatprep.subr.mxu1 %v555_v0 }
 0x175   :  { %456 = vmatpush3.msra.mxu1 %v162_v56 }
 0x176   :  { %457 = vmatprep.subr.mxu1 %v555_v0 }
 0x177   :  { %458 = vmatpush3.msra.mxu1 %v155_v59 }
 0x178   :  { %459 = vmatprep.subr.mxu1 %v555_v0 }
 0x179   :  { %460 = vmatpush3.msra.mxu1 %v148_v60 }
 0x17a   :  { %462 = vmatmul.mubr.msk.f32.vlgmr.msra.gmra.mxu1 %vm204_vm5, %v203_v61 }
 0x17d   :  { %v296_v1 = vpop.permute.xlu0 %295 }
 0x17e   :  { %v374_v6 = vadd.f32 %v373_v62, %v296_v1 }
 0x23a   :  { %v274_v2 = vpop.f32.mrf.mxu1 }
 0x23b   :  { %vm278_vm6 = vcmp.gt.f32.partialorder %v274_v2, 0.0  ;;  %v279_v3 = vmul.f32 0.2, %v274_v2 }
 0x23c   :  { %v463_v5 = vpop.f32.mrf.mxu1 }
 0x23d   :  { %v280_v7 = vsel %vm278_vm6, %v274_v2, %v279_v3 }
 0x23e   :  { %v379_v8 = vmul.f32 %v378_v4, %v280_v7 }
 0x240   :  { %v380_v9 = vadd.f32 %v379_v8, %v374_v6 }
 0x242   :  { %381 = vst [vmem:[#allocation8] sm:$0xff] %v380_v9 }
 0x243   :  { %536 = shalt.err (!%p533_p0)
}
 0x244   :  { %391 = dma.vmem_to_hbm [thread:$0]  %s389_s27, 128, %s666_s7, [#allocation5]  }
 0x245   :  { %549 = dma.done.wait [#allocation5], 128  }
 0x246   :  { %550 = vsyncadd [#allocation5], 4294967168 }
 0x247   :  { %395 = vsyncpa [#allocation4], 1 }
 0x248   :  { %396 = vsyncpa [#allocation7], 1 }
 0x249   :  { %397 = vsyncpa [#allocation5], 1 }

</bundles_post_ra>
